<compile_context>
chip_gen: v6e
topology: v6e:2x2x1
jax: 0.10.0
libtpu: 0.0.40
codegen_flags: <defaults>
</compile_context>

<pallas_src>
import functools

import jax
import jax.numpy as jnp
from jax.experimental import pallas as pl
from jax.experimental.pallas import tpu as pltpu


def graphsage_mean_kernel(flags_ref,            # SMEM: (grid_n, grid_k) int32 block-nonzero flags
                          adj_ref,              # (tile_n, tile_k) bf16 adjacency block
                          hk_ref,               # (tile_k, f_in)  f32 neighbor-feature block
                          hself_ref,            # (tile_n, f_in)  f32 self-feature tile
                          w_ref,                # (f_in, f_out_p) f32 weight (lane-padded)
                          b_ref,                # (1, f_out_p)    f32 bias   (lane-padded)
                          out_ref,              # (tile_n, f_out_p) f32 output tile
                          acc_ref,              # VMEM scratch (tile_n, f_in) f32 neighbor-sum
                          deg_ref):             # VMEM scratch (tile_n, 1)    f32 in-degree
    i = pl.program_id(0)
    k = pl.program_id(1)

    @pl.when(k == 0)
    def _init():
        acc_ref[...] = jnp.zeros_like(acc_ref)
        deg_ref[...] = jnp.zeros_like(deg_ref)

    # Skip all compute on all-zero adjacency blocks (block sparsity).
    @pl.when(flags_ref[i, k] != 0)
    def _accumulate():
        adj = adj_ref[...].astype(jnp.float32)          # 0/1 bf16 -> f32, exact
        acc_ref[...] += jnp.dot(adj, hk_ref[...],
                                preferred_element_type=jnp.float32)
        deg_ref[...] += jnp.sum(adj, axis=-1, keepdims=True)

    @pl.when(k == pl.num_programs(1) - 1)
    def _finalize():
        # approx=True would move this fully onto the EUP but loosens numerics.
        inv_deg = pl.reciprocal(deg_ref[...], approx=False)     # (tile_n, 1)
        agg = (acc_ref[...] + hself_ref[...]) * inv_deg         # (tile_n, f_in)
        z = jnp.dot(agg, w_ref[...],
                    preferred_element_type=jnp.float32) + b_ref[...]
        out_ref[...] = jnp.maximum(z, 0.0)


@functools.partial(jax.jit, static_argnames=("tile_n", "tile_k"))
def graphsage_layer(adj, h, w, b, *, tile_n=256, tile_k=512):
    """adj: (N, N) float32 0/1, h: (N, F_in), w: (F_in, F_out), b: (F_out,)."""
    n, f_in = h.shape
    f_out = w.shape[1]

    tile_n = min(tile_n, n)
    tile_k = min(tile_k, n)
    assert n % tile_n == 0 and n % tile_k == 0, "N must be divisible by the tiles"
    grid_n, grid_k = n // tile_n, n // tile_k

    # Lane-dense output: pad F_out (and W, b) up to a multiple of 128 lanes.
    f_out_p = ((f_out + 127) // 128) * 128
    w_p = jnp.pad(w.astype(jnp.float32), ((0, 0), (0, f_out_p - f_out)))
    b_p = jnp.pad(b.astype(jnp.float32), (0, f_out_p - f_out)).reshape(1, f_out_p)

    # bf16 adjacency: 0/1 is exact, halves the dominant N^2 HBM traffic.
    adj_bf16 = adj.astype(jnp.bfloat16)

    # Per-(i, k) adjacency-block nonzero flags for block-sparse compute skip.
    flags = (adj.reshape(grid_n, tile_n, grid_k, tile_k)
                .sum(axis=(1, 3)) > 0).astype(jnp.int32)

    # VMEM budget (double-buffered inputs/outputs + scratch), f32 unless noted:
    #   adj 2*tile_n*tile_k*2B, hk 2*tile_k*f_in*4B, hself 2*tile_n*f_in*4B,
    #   w 2*f_in*f_out_p*4B, b ~0, out 2*tile_n*f_out_p*4B,
    #   acc tile_n*f_in*4B, deg tile_n*4B.
    # For tile_n=256, tile_k=512, f_in<=1024: well under 16 MiB; the 32 MiB
    # limit leaves headroom on every chip (v7x physical VMEM is 64 MiB).
    vmem_limit = 32 * 1024 * 1024

    out_padded = pl.pallas_call(
        graphsage_mean_kernel,
        out_shape=jax.ShapeDtypeStruct((n, f_out_p), jnp.float32),
        grid_spec=pltpu.PrefetchScalarGridSpec(
            num_scalar_prefetch=1,                 # `flags` lands in SMEM
            grid=(grid_n, grid_k),
            in_specs=[
                pl.BlockSpec((tile_n, tile_k), lambda i, k, flags: (i, k)),   # adj block
                pl.BlockSpec((tile_k, f_in), lambda i, k, flags: (k, 0)),     # neighbor feats
                pl.BlockSpec((tile_n, f_in), lambda i, k, flags: (i, 0)),     # self feats
                pl.BlockSpec((f_in, f_out_p), lambda i, k, flags: (0, 0)),    # weight
                pl.BlockSpec((1, f_out_p), lambda i, k, flags: (0, 0)),       # bias
            ],
            out_specs=pl.BlockSpec((tile_n, f_out_p), lambda i, k, flags: (i, 0)),
            scratch_shapes=[
                pltpu.VMEM((tile_n, f_in), jnp.float32),   # neighbor-sum accumulator
                pltpu.VMEM((tile_n, 1), jnp.float32),      # in-degree accumulator
            ],
        ),
        compiler_params=pltpu.CompilerParams(
            dimension_semantics=("parallel", "arbitrary"),
            vmem_limit_bytes=vmem_limit,
        ),
    )(flags, adj_bf16, h, h, w_p, b_p)

    return out_padded[:, :f_out]


def reference(adj, h, w, b):
    # Exact-f32 reference (HIGHEST precision forces full-precision MXU passes).
    deg = jnp.sum(adj, axis=-1, keepdims=True)
    agg = (jnp.dot(adj, h, precision=jax.lax.Precision.HIGHEST) + h) / deg
    z = jnp.dot(agg, w, precision=jax.lax.Precision.HIGHEST) + b[None, :]
    return jnp.maximum(z, 0.0)


if __name__ == "__main__":
    N, F_IN, F_OUT = 128, 32, 16
    key = jax.random.PRNGKey(0)
    k_h, k_adj, k_w, k_b = jax.random.split(key, 4)

    # node features
    h = jax.random.normal(k_h, (N, F_IN), dtype=jnp.float32)

    # random directed graph; guarantee in_degree >= 1 for every node
    adj = (jax.random.uniform(k_adj, (N, N)) < 0.1).astype(jnp.float32)
    adj = adj.at[jnp.arange(N), (jnp.arange(N) + 1) % N].set(1.0)
    adj = adj.at[jnp.arange(N), jnp.arange(N)].set(0.0)  # no self-loops

    # nn.Linear(in_feats, out_feats): weight (F_OUT, F_IN) xavier_uniform,
    # gain = calculate_gain('relu') = sqrt(2); bias uniform(-1/sqrt(in), 1/sqrt(in)).
    gain = jnp.sqrt(2.0)
    bound_w = gain * jnp.sqrt(6.0 / (F_IN + F_OUT))
    w_pt = jax.random.uniform(k_w, (F_OUT, F_IN), minval=-bound_w, maxval=bound_w,
                              dtype=jnp.float32)
    bound_b = 1.0 / jnp.sqrt(F_IN)
    b = jax.random.uniform(k_b, (F_OUT,), minval=-bound_b, maxval=bound_b,
                           dtype=jnp.float32)
    w = w_pt.T  # (F_IN, F_OUT) so kernel does agg @ w == agg @ W^T

    out = graphsage_layer(adj, h, w, b)
    out = jax.block_until_ready(out)

    ref = jax.block_until_ready(reference(adj, h, w, b))
    assert out.shape == (N, F_OUT)
    # Tolerance covers worst-case bf16-pass MXU rounding of default-precision
    # f32 matmuls (~5e-3 absolute on O(1) values); any semantic error in the
    # aggregation/linear/ReLU path produces O(0.1-1) discrepancies.
    assert jnp.allclose(out, ref, atol=1e-2, rtol=1e-2), (
        float(jnp.max(jnp.abs(out - ref))))

    print("KERNEL_OK")
</pallas_src>

<mosaic_0001>
module attributes {stable_mosaic.version = 11 : i64} {
  func.func @graphsage_mean_kernel(%arg0: i32, %arg1: i32, %arg2: memref<1x1xi32, #tpu.memory_space<smem>>, %arg3: memref<128x128xbf16, #tpu.memory_space<vmem>>, %arg4: memref<128x32xf32, #tpu.memory_space<vmem>>, %arg5: memref<128x32xf32, #tpu.memory_space<vmem>>, %arg6: memref<32x128xf32, #tpu.memory_space<vmem>>, %arg7: memref<1x128xf32, #tpu.memory_space<vmem>>, %arg8: memref<128x128xf32, #tpu.memory_space<vmem>>, %arg9: memref<128x32xf32, #tpu.memory_space<vmem>>, %arg10: memref<128x1xf32, #tpu.memory_space<vmem>>) attributes {dimension_semantics = [#tpu.dimension_semantics<parallel>, #tpu.dimension_semantics<arbitrary>], iteration_bounds = array<i64: 1, 1>, scalar_prefetch = 1 : i64, scratch_operands = 2 : i64, tpu.core_type = #tpu.core_type<tc>, window_params = [{transform_indices = @transform_0, window_bounds = array<i64: 128, 128>}, {transform_indices = @transform_1, window_bounds = array<i64: 128, 32>}, {transform_indices = @transform_2, window_bounds = array<i64: 128, 32>}, {pipeline_mode = #tpu.pipeline_mode<synchronous>, transform_indices = @transform_3, window_bounds = array<i64: 32, 128>}, {pipeline_mode = #tpu.pipeline_mode<synchronous>, transform_indices = @transform_4, window_bounds = array<i64: 1, 128>}, {transform_indices = @transform_5, window_bounds = array<i64: 128, 128>}]} {
    %c0_i32 = arith.constant 0 : i32
    %0 = arith.cmpi eq, %arg1, %c0_i32 : i32
    %1 = arith.extui %0 : i1 to i32
    %c0_i32_0 = arith.constant 0 : i32
    %2 = arith.cmpi ne, %1, %c0_i32_0 : i32
    scf.if %2 {
      %cst = arith.constant 0.000000e+00 : f32
      %12 = vector.broadcast %cst : f32 to vector<128x32xf32>
      %c0 = arith.constant 0 : index
      %c0_5 = arith.constant 0 : index
      %13 = vector.load %arg9[%c0, %c0_5] : memref<128x32xf32, #tpu.memory_space<vmem>>, vector<128x32xf32>
      tpu.vector_store %arg9[%c0, %c0_5], %12 {strides = array<i32>} : memref<128x32xf32, #tpu.memory_space<vmem>>, vector<128x32xf32>,
      %cst_6 = arith.constant 0.000000e+00 : f32
      %14 = vector.broadcast %cst_6 : f32 to vector<128x1xf32>
      %c0_7 = arith.constant 0 : index
      %c0_8 = arith.constant 0 : index
      %15 = vector.load %arg10[%c0_7, %c0_8] : memref<128x1xf32, #tpu.memory_space<vmem>>, vector<128x1xf32>
      tpu.vector_store %arg10[%c0_7, %c0_8], %14 {strides = array<i32>} : memref<128x1xf32, #tpu.memory_space<vmem>>, vector<128x1xf32>,
    } else {
    }
    %3 = arith.index_cast %arg0 : i32 to index
    %4 = arith.index_cast %arg1 : i32 to index
    %5 = memref.load %arg2[%3, %4] : memref<1x1xi32, #tpu.memory_space<smem>>
    %c0_i32_1 = arith.constant 0 : i32
    %6 = arith.cmpi ne, %5, %c0_i32_1 : i32
    %7 = arith.extui %6 : i1 to i32
    %c0_i32_2 = arith.constant 0 : i32
    %8 = arith.cmpi ne, %7, %c0_i32_2 : i32
    scf.if %8 {
      %c0 = arith.constant 0 : index
      %c0_5 = arith.constant 0 : index
      %12 = vector.load %arg3[%c0, %c0_5] : memref<128x128xbf16, #tpu.memory_space<vmem>>, vector<128x128xbf16>
      %13 = arith.extf %12 : vector<128x128xbf16> to vector<128x128xf32>
      %c0_6 = arith.constant 0 : index
      %c0_7 = arith.constant 0 : index
      %14 = vector.load %arg9[%c0_6, %c0_7] : memref<128x32xf32, #tpu.memory_space<vmem>>, vector<128x32xf32>
      %c0_8 = arith.constant 0 : index
      %c0_9 = arith.constant 0 : index
      %15 = vector.load %arg4[%c0_8, %c0_9] : memref<128x32xf32, #tpu.memory_space<vmem>>, vector<128x32xf32>
      %cst = arith.constant dense<0.000000e+00> : vector<128x32xf32>
      %16 = tpu.matmul %13, %15, %cst {dimension_numbers = #tpu.dot_dimension_numbers<[1], [0], [0], [1], [0, 0, 1, 1], [], []>} : vector<128x128xf32>, vector<128x32xf32>, vector<128x32xf32> -> vector<128x32xf32>
      %17 = arith.addf %14, %16 : vector<128x32xf32>
      %c0_10 = arith.constant 0 : index
      %c0_11 = arith.constant 0 : index
      %18 = vector.load %arg9[%c0_10, %c0_11] : memref<128x32xf32, #tpu.memory_space<vmem>>, vector<128x32xf32>
      tpu.vector_store %arg9[%c0_10, %c0_11], %17 {strides = array<i32>} : memref<128x32xf32, #tpu.memory_space<vmem>>, vector<128x32xf32>,
      %c0_12 = arith.constant 0 : index
      %c0_13 = arith.constant 0 : index
      %19 = vector.load %arg10[%c0_12, %c0_13] : memref<128x1xf32, #tpu.memory_space<vmem>>, vector<128x1xf32>
      %cst_14 = arith.constant dense<0.000000e+00> : vector<128xf32>
      %20 = vector.multi_reduction <add>, %13, %cst_14 [1] : vector<128x128xf32> to vector<128xf32>
      %21 = vector.shape_cast %20 : vector<128xf32> to vector<128x1xf32>
      %22 = arith.addf %19, %21 : vector<128x1xf32>
      %c0_15 = arith.constant 0 : index
      %c0_16 = arith.constant 0 : index
      %23 = vector.load %arg10[%c0_15, %c0_16] : memref<128x1xf32, #tpu.memory_space<vmem>>, vector<128x1xf32>
      tpu.vector_store %arg10[%c0_15, %c0_16], %22 {strides = array<i32>} : memref<128x1xf32, #tpu.memory_space<vmem>>, vector<128x1xf32>,
    } else {
    }
    %c0_i32_3 = arith.constant 0 : i32
    %9 = arith.cmpi eq, %arg1, %c0_i32_3 : i32
    %10 = arith.extui %9 : i1 to i32
    %c0_i32_4 = arith.constant 0 : i32
    %11 = arith.cmpi ne, %10, %c0_i32_4 : i32
    scf.if %11 {
      %c0 = arith.constant 0 : index
      %c0_5 = arith.constant 0 : index
      %12 = vector.load %arg10[%c0, %c0_5] : memref<128x1xf32, #tpu.memory_space<vmem>>, vector<128x1xf32>
      %13 = tpu.reciprocal %12 : vector<128x1xf32> -> vector<128x1xf32>
      %c0_6 = arith.constant 0 : index
      %c0_7 = arith.constant 0 : index
      %14 = vector.load %arg9[%c0_6, %c0_7] : memref<128x32xf32, #tpu.memory_space<vmem>>, vector<128x32xf32>
      %c0_8 = arith.constant 0 : index
      %c0_9 = arith.constant 0 : index
      %15 = vector.load %arg5[%c0_8, %c0_9] : memref<128x32xf32, #tpu.memory_space<vmem>>, vector<128x32xf32>
      %16 = arith.addf %14, %15 : vector<128x32xf32>
      %17 = vector.broadcast %13 : vector<128x1xf32> to vector<128x32xf32>
      %18 = arith.mulf %16, %17 : vector<128x32xf32>
      %c0_10 = arith.constant 0 : index
      %c0_11 = arith.constant 0 : index
      %19 = vector.load %arg6[%c0_10, %c0_11] : memref<32x128xf32, #tpu.memory_space<vmem>>, vector<32x128xf32>
      %cst = arith.constant dense<0.000000e+00> : vector<128x128xf32>
      %20 = tpu.matmul %18, %19, %cst {dimension_numbers = #tpu.dot_dimension_numbers<[1], [0], [0], [1], [0, 0, 1, 1], [], []>} : vector<128x32xf32>, vector<32x128xf32>, vector<128x128xf32> -> vector<128x128xf32>
      %c0_12 = arith.constant 0 : index
      %c0_13 = arith.constant 0 : index
      %21 = vector.load %arg7[%c0_12, %c0_13] : memref<1x128xf32, #tpu.memory_space<vmem>>, vector<1x128xf32>
      %22 = vector.broadcast %21 : vector<1x128xf32> to vector<128x128xf32>
      %23 = arith.addf %20, %22 : vector<128x128xf32>
      %cst_14 = arith.constant 0.000000e+00 : f32
      %24 = vector.broadcast %cst_14 : f32 to vector<128x128xf32>
      %25 = arith.maximumf %23, %24 : vector<128x128xf32>
      %c0_15 = arith.constant 0 : index
      %c0_16 = arith.constant 0 : index
      %26 = vector.load %arg8[%c0_15, %c0_16] : memref<128x128xf32, #tpu.memory_space<vmem>>, vector<128x128xf32>
      tpu.vector_store %arg8[%c0_15, %c0_16], %25 {strides = array<i32>} : memref<128x128xf32, #tpu.memory_space<vmem>>, vector<128x128xf32>,
    } else {
    }
    return
  }
  func.func @transform_0(%arg0: i32, %arg1: i32, %arg2: memref<1x1xi32, #tpu.memory_space<smem>>) -> (i32, i32) {
    %c0_i32 = arith.constant 0 : i32
    return %arg0, %arg1 : i32, i32
  }
  func.func @transform_1(%arg0: i32, %arg1: i32, %arg2: memref<1x1xi32, #tpu.memory_space<smem>>) -> (i32, i32) {
    %c0_i32 = arith.constant 0 : i32
    %c0_i32_0 = arith.constant 0 : i32
    return %arg1, %c0_i32 : i32, i32
  }
  func.func @transform_2(%arg0: i32, %arg1: i32, %arg2: memref<1x1xi32, #tpu.memory_space<smem>>) -> (i32, i32) {
    %c0_i32 = arith.constant 0 : i32
    %c0_i32_0 = arith.constant 0 : i32
    return %arg0, %c0_i32 : i32, i32
  }
  func.func @transform_3(%arg0: i32, %arg1: i32, %arg2: memref<1x1xi32, #tpu.memory_space<smem>>) -> (i32, i32) {
    %c0_i32 = arith.constant 0 : i32
    %c0_i32_0 = arith.constant 0 : i32
    %c0_i32_1 = arith.constant 0 : i32
    return %c0_i32, %c0_i32_0 : i32, i32
  }
  func.func @transform_4(%arg0: i32, %arg1: i32, %arg2: memref<1x1xi32, #tpu.memory_space<smem>>) -> (i32, i32) {
    %c0_i32 = arith.constant 0 : i32
    %c0_i32_0 = arith.constant 0 : i32
    %c0_i32_1 = arith.constant 0 : i32
    return %c0_i32, %c0_i32_0 : i32, i32
  }
  func.func @transform_5(%arg0: i32, %arg1: i32, %arg2: memref<1x1xi32, #tpu.memory_space<smem>>) -> (i32, i32) {
    %c0_i32 = arith.constant 0 : i32
    %c0_i32_0 = arith.constant 0 : i32
    return %arg0, %c0_i32 : i32, i32
  }
}

</mosaic_0001>

<bundles_post_ra>
// kernel: graphsage_layer.1
= control target key start
LH: loop header
LB: loop body
LE: loop exit
PB: predicated region body
PF: predicated region fallthrough
CT: control target
= control target key end

     0   :  { %vm26_vm0 = vcmask 261120   ;;  %vm43_vm1 = vcmask 7168   ;;  %v1084_v0 = vmov 0.0   ;;  %s1387_s0 = inlined_call_operand.<no memory space> [shape: s32[1,1], index: 0, kind: input, shape index: {}]   ;;  %s1388_s1 = inlined_call_operand.vmem [shape: bf16[128,128], index: 1, kind: input, shape index: {}]   ;;  %s1389_s2 = inlined_call_operand.vmem [shape: f32[128,32], index: 2, kind: input, shape index: {}, may-alias: {2,3}]   ;;  %s1390_s3 = inlined_call_operand.vmem [shape: f32[128,32], index: 3, kind: input, shape index: {}, may-alias: {2,3}]   ;;  %s1391_s4 = inlined_call_operand.vmem [shape: f32[32,128], index: 4, kind: input, shape index: {}]   ;;  %s1392_s5 = inlined_call_operand.vmem [shape: f32[1,128], index: 5, kind: input, shape index: {}]   ;;  %s1393_s6 = inlined_call_operand.vmem [shape: f32[128,128], index: 6, kind: output, shape index: {}]  }
   0x1   :  { %27 = vst.msk [vmem:[#allocation2] sm:$0xff] %vm26_vm0, %v1084_v0  ;;  %28 = vst.msk [vmem:[#allocation2 + $0x8] sm:$0xff] %vm26_vm0, %v1084_v0  ;;  %p811_p0 = scmp.eq.s32.totalorder %s1387_s0, 0 }
   0x2   :  { %29 = vst.msk [vmem:[#allocation2 + $0x10] sm:$0xff] %vm26_vm0, %v1084_v0  ;;  %30 = vst.msk [vmem:[#allocation2 + $0x18] sm:$0xff] %vm26_vm0, %v1084_v0 }
   0x3   :  { %31 = vst.msk [vmem:[#allocation2 + $0x20] sm:$0xff] %vm26_vm0, %v1084_v0  ;;  %32 = vst.msk [vmem:[#allocation2 + $0x28] sm:$0xff] %vm26_vm0, %v1084_v0 }
   0x4   :  { %33 = vst.msk [vmem:[#allocation2 + $0x30] sm:$0xff] %vm26_vm0, %v1084_v0  ;;  %34 = vst.msk [vmem:[#allocation2 + $0x38] sm:$0xff] %vm26_vm0, %v1084_v0 }
   0x5   :  { %35 = vst.msk [vmem:[#allocation2 + $0x40] sm:$0xff] %vm26_vm0, %v1084_v0  ;;  %36 = vst.msk [vmem:[#allocation2 + $0x48] sm:$0xff] %vm26_vm0, %v1084_v0 }
   0x6   :  { %37 = vst.msk [vmem:[#allocation2 + $0x50] sm:$0xff] %vm26_vm0, %v1084_v0  ;;  %38 = vst.msk [vmem:[#allocation2 + $0x58] sm:$0xff] %vm26_vm0, %v1084_v0 }
   0x7   :  { %39 = vst.msk [vmem:[#allocation2 + $0x60] sm:$0xff] %vm26_vm0, %v1084_v0  ;;  %40 = vst.msk [vmem:[#allocation2 + $0x68] sm:$0xff] %vm26_vm0, %v1084_v0 }
   0x8   :  { %41 = vst.msk [vmem:[#allocation2 + $0x70] sm:$0xff] %vm26_vm0, %v1084_v0  ;;  %42 = vst.msk [vmem:[#allocation2 + $0x78] sm:$0xff] %vm26_vm0, %v1084_v0 }
   0x9   :  { %44 = vst.msk [vmem:[#allocation3] sm:$0xff] %vm43_vm1, %v1084_v0  ;;  %45 = vst.msk [vmem:[#allocation3 + $0x8] sm:$0xff] %vm43_vm1, %v1084_v0 }
   0xa   :  { %46 = vst.msk [vmem:[#allocation3 + $0x10] sm:$0xff] %vm43_vm1, %v1084_v0  ;;  %47 = vst.msk [vmem:[#allocation3 + $0x18] sm:$0xff] %vm43_vm1, %v1084_v0 }
   0xb   :  { %48 = vst.msk [vmem:[#allocation3 + $0x20] sm:$0xff] %vm43_vm1, %v1084_v0  ;;  %49 = vst.msk [vmem:[#allocation3 + $0x28] sm:$0xff] %vm43_vm1, %v1084_v0 }
   0xc   :  { %50 = vst.msk [vmem:[#allocation3 + $0x30] sm:$0xff] %vm43_vm1, %v1084_v0  ;;  %51 = vst.msk [vmem:[#allocation3 + $0x38] sm:$0xff] %vm43_vm1, %v1084_v0  ;;  %67 = sbr.rel (%p811_p0) target bundleno = 261 (0x105), region = 29 }
   0xd   :  { %52 = vst.msk [vmem:[#allocation3 + $0x40] sm:$0xff] %vm43_vm1, %v1084_v0  ;;  %53 = vst.msk [vmem:[#allocation3 + $0x48] sm:$0xff] %vm43_vm1, %v1084_v0 }
   0xe   :  { %54 = vst.msk [vmem:[#allocation3 + $0x50] sm:$0xff] %vm43_vm1, %v1084_v0  ;;  %55 = vst.msk [vmem:[#allocation3 + $0x58] sm:$0xff] %vm43_vm1, %v1084_v0 }
   0xf   :  { %56 = vst.msk [vmem:[#allocation3 + $0x60] sm:$0xff] %vm43_vm1, %v1084_v0  ;;  %57 = vst.msk [vmem:[#allocation3 + $0x68] sm:$0xff] %vm43_vm1, %v1084_v0 }
  0x10   :  { %58 = vst.msk [vmem:[#allocation3 + $0x70] sm:$0xff] %vm43_vm1, %v1084_v0  ;;  %59 = vst.msk [vmem:[#allocation3 + $0x78] sm:$0xff] %vm43_vm1, %v1084_v0 }
  0x11   :  { %v131_v1 = vld [vmem:[%s1389_s2 + $0x78] sm:$0xff]  ;;  %v130_v2 = vld [vmem:[%s1389_s2 + $0x70] sm:$0xff]  ;;  %v129_v3 = vld [vmem:[%s1389_s2 + $0x68] sm:$0xff] }
  0x12   :  { %920 = vmatprep.subr.mxu0 %v131_v1  ;;  %1008 = vmatprep.subr.mxu1 %v131_v1  ;;  %v128_v4 = vld [vmem:[%s1389_s2 + $0x60] sm:$0xff]  ;;  %v127_v5 = vld [vmem:[%s1389_s2 + $0x58] sm:$0xff]  ;;  %v126_v6 = vld [vmem:[%s1389_s2 + $0x50] sm:$0xff] }
  0x13   :  { %921 = vmatpush3.msra.mxu0 %v131_v1  ;;  %1024 = vmatpush3.msra.mxu1 %v131_v1  ;;  %v125_v7 = vld [vmem:[%s1389_s2 + $0x48] sm:$0xff]  ;;  %v124_v8 = vld [vmem:[%s1389_s2 + $0x40] sm:$0xff]  ;;  %v123_v9 = vld [vmem:[%s1389_s2 + $0x38] sm:$0xff] }
  0x14   :  { %922 = vmatprep.subr.mxu0 %v130_v2  ;;  %1009 = vmatprep.subr.mxu1 %v130_v2  ;;  %v122_v10 = vld [vmem:[%s1389_s2 + $0x30] sm:$0xff]  ;;  %v121_v11 = vld [vmem:[%s1389_s2 + $0x28] sm:$0xff]  ;;  %v120_v12 = vld [vmem:[%s1389_s2 + $0x20] sm:$0xff] }
  0x15   :  { %923 = vmatpush3.msra.mxu0 %v130_v2  ;;  %1025 = vmatpush3.msra.mxu1 %v130_v2  ;;  %v119_v13 = vld [vmem:[%s1389_s2 + $0x18] sm:$0xff]  ;;  %v118_v14 = vld [vmem:[%s1389_s2 + $0x10] sm:$0xff]  ;;  %v117_v15 = vld [vmem:[%s1389_s2 + $0x8] sm:$0xff] }
  0x16   :  { %924 = vmatprep.subr.mxu0 %v129_v3  ;;  %1010 = vmatprep.subr.mxu1 %v129_v3  ;;  %v830_v16 = vld [vmem:[%s1388_s1] sm:$0xff]   ;;  %v861_v19 = vld [vmem:[%s1388_s1 + $0x8] sm:$0xff]   ;;  %v862_v27 = vld [vmem:[%s1388_s1 + $0x10] sm:$0xff]  }
  0x17   :  { %925 = vmatpush3.msra.mxu0 %v129_v3  ;;  %1026 = vmatpush3.msra.mxu1 %v129_v3  ;;  %v864_v17 = vld [vmem:[%s1388_s1 + $0x20] sm:$0xff]   ;;  %v865_v20 = vld [vmem:[%s1388_s1 + $0x28] sm:$0xff]   ;;  %v831_v21 = vunpack.c.l.bf16 %v830_v16  ;;  %v832_v23 = vunpack.c.h.bf16 %v830_v16  ;;  %v835_v25 = vunpack.c.l.bf16 %v861_v19  ;;  %v866_v28 = vld [vmem:[%s1388_s1 + $0x30] sm:$0xff]   ;;  %v836_v29 = vunpack.c.h.bf16 %v861_v19 }
  0x18   :  { %926 = vmatprep.subr.mxu0 %v128_v4  ;;  %1011 = vmatprep.subr.mxu1 %v128_v4  ;;  %v116_v18 = vld [vmem:[%s1389_s2] sm:$0xff]  ;;  %v847_v22 = vunpack.c.l.bf16 %v864_v17  ;;  %v848_v24 = vunpack.c.h.bf16 %v864_v17  ;;  %v851_v26 = vunpack.c.l.bf16 %v865_v20  ;;  %v852_v30 = vunpack.c.h.bf16 %v865_v20  ;;  %v863_v33 = vld [vmem:[%s1388_s1 + $0x18] sm:$0xff]   ;;  %v312_v41 = vld [vmem:[#allocation3 + $0x10] sm:$0xff] }
  0x19   :  { %927 = vmatpush3.msra.mxu0 %v128_v4  ;;  %1027 = vmatpush3.msra.mxu1 %v128_v4  ;;  %v839_v31 = vunpack.c.l.bf16 %v862_v27  ;;  %v855_v32 = vunpack.c.l.bf16 %v866_v28  ;;  %v867_v34 = vld [vmem:[%s1388_s1 + $0x38] sm:$0xff]   ;;  %v840_v35 = vunpack.c.h.bf16 %v862_v27  ;;  %v856_v36 = vunpack.c.h.bf16 %v866_v28  ;;  %v310_v42 = vld [vmem:[#allocation3] sm:$0xff]  ;;  %v311_v48 = vld [vmem:[#allocation3 + $0x8] sm:$0xff] }
  0x1a   :  { %928 = vmatprep.subr.mxu0 %v127_v5  ;;  %1012 = vmatprep.subr.mxu1 %v127_v5  ;;  %v843_v37 = vunpack.c.l.bf16 %v863_v33  ;;  %v859_v38 = vunpack.c.l.bf16 %v867_v34  ;;  %v844_v39 = vunpack.c.h.bf16 %v863_v33  ;;  %v860_v40 = vunpack.c.h.bf16 %v867_v34  ;;  %v313_v47 = vld [vmem:[#allocation3 + $0x18] sm:$0xff]  ;;  %v315_v53 = vld [vmem:[#allocation3 + $0x28] sm:$0xff]  ;;  %v314_v54 = vld [vmem:[#allocation3 + $0x20] sm:$0xff] }
  0x1b   :  { %929 = vmatpush3.msra.mxu0 %v127_v5  ;;  %1028 = vmatpush3.msra.mxu1 %v127_v5  ;;  %v317_v59 = vld [vmem:[#allocation3 + $0x38] sm:$0xff]  ;;  %v316_v60 = vld [vmem:[#allocation3 + $0x30] sm:$0xff]  ;;  %v319_v1 = vld [vmem:[#allocation3 + $0x48] sm:$0xff] }
  0x1c   :  { %930 = vmatprep.subr.mxu0 %v126_v6  ;;  %1013 = vmatprep.subr.mxu1 %v126_v6  ;;  %v318_v2 = vld [vmem:[#allocation3 + $0x40] sm:$0xff]  ;;  %v325_v19 = vld [vmem:[#allocation3 + $0x78] sm:$0xff]  ;;  %v324_v20 = vld [vmem:[#allocation3 + $0x70] sm:$0xff] }
  0x1d   :  { %931 = vmatpush3.msra.mxu0 %v126_v6  ;;  %1029 = vmatpush3.msra.mxu1 %v126_v6 }
  0x1e   :  { %932 = vmatprep.subr.mxu0 %v125_v7  ;;  %1014 = vmatprep.subr.mxu1 %v125_v7 }
  0x1f   :  { %933 = vmatpush3.msra.mxu0 %v125_v7  ;;  %1030 = vmatpush3.msra.mxu1 %v125_v7  ;;  %v321_v7 = vld [vmem:[#allocation3 + $0x58] sm:$0xff] }
  0x20   :  { %934 = vmatprep.subr.mxu0 %v124_v8  ;;  %1015 = vmatprep.subr.mxu1 %v124_v8 }
  0x21   :  { %935 = vmatpush3.msra.mxu0 %v124_v8  ;;  %1031 = vmatpush3.msra.mxu1 %v124_v8  ;;  %v320_v8 = vld [vmem:[#allocation3 + $0x50] sm:$0xff] }
  0x22   :  { %936 = vmatprep.subr.mxu0 %v123_v9  ;;  %1016 = vmatprep.subr.mxu1 %v123_v9 }
  0x23   :  { %937 = vmatpush3.msra.mxu0 %v123_v9  ;;  %1032 = vmatpush3.msra.mxu1 %v123_v9 }
  0x24   :  { %938 = vmatprep.subr.mxu0 %v122_v10  ;;  %1017 = vmatprep.subr.mxu1 %v122_v10 }
  0x25   :  { %939 = vmatpush3.msra.mxu0 %v122_v10  ;;  %1033 = vmatpush3.msra.mxu1 %v122_v10 }
  0x26   :  { %940 = vmatprep.subr.mxu0 %v121_v11  ;;  %1018 = vmatprep.subr.mxu1 %v121_v11 }
  0x27   :  { %941 = vmatpush3.msra.mxu0 %v121_v11  ;;  %1034 = vmatpush3.msra.mxu1 %v121_v11 }
  0x28   :  { %942 = vmatprep.subr.mxu0 %v120_v12  ;;  %1019 = vmatprep.subr.mxu1 %v120_v12 }
  0x29   :  { %943 = vmatpush3.msra.mxu0 %v120_v12  ;;  %1035 = vmatpush3.msra.mxu1 %v120_v12 }
  0x2a   :  { %944 = vmatprep.subr.mxu0 %v119_v13  ;;  %1020 = vmatprep.subr.mxu1 %v119_v13 }
  0x2b   :  { %945 = vmatpush3.msra.mxu0 %v119_v13  ;;  %1036 = vmatpush3.msra.mxu1 %v119_v13  ;;  %v323_v13 = vld [vmem:[#allocation3 + $0x68] sm:$0xff] }
  0x2c   :  { %946 = vmatprep.subr.mxu0 %v118_v14  ;;  %1021 = vmatprep.subr.mxu1 %v118_v14 }
  0x2d   :  { %947 = vmatpush3.msra.mxu0 %v118_v14  ;;  %1037 = vmatpush3.msra.mxu1 %v118_v14  ;;  %v322_v14 = vld [vmem:[#allocation3 + $0x60] sm:$0xff] }
  0x2e   :  { %948 = vmatprep.subr.mxu0 %v117_v15  ;;  %1022 = vmatprep.subr.mxu1 %v117_v15 }
  0x2f   :  { %949 = vmatpush3.msra.mxu0 %v117_v15  ;;  %1038 = vmatpush3.msra.mxu1 %v117_v15 }
  0x30   :  { %950 = vmatprep.subr.mxu0 %v116_v18  ;;  %1023 = vmatprep.subr.mxu1 %v116_v18 }
  0x31   :  { %951 = vmatpush3.msra.mxu0 %v116_v18  ;;  %1039 = vmatpush3.msra.mxu1 %v116_v18 }
  0x32   :  { %952 = vmatprep.mubr.f32.mxu0 %v831_v21  ;;  %964 = vmatprep.mubr.f32.mxu1 %v847_v22 }
  0x33   :  { %953 = vmatmul.mubr.f32.vlgmr.msra.gmra.mxu0 %v832_v23  ;;  %965 = vmatmul.mubr.f32.vlgmr.msra.gmra.mxu1 %v848_v24 }
  0x34   :  { %955 = vmatprep.mubr.f32.mxu0 %v835_v25  ;;  %967 = vmatprep.mubr.f32.mxu1 %v851_v26 }
  0x35   :  { %330 = vadd.xlane.f32.xlu1 %v835_v25  ;;  %326 = vadd.xlane.f32.xlu0 %v831_v21  ;;  %v101_v25 = vld [vmem:[#allocation2 + $0x8] sm:$0xff] }
  0x37   :  { %956 = vmatmul.mubr.f32.gmra.mxu0 %v836_v29  ;;  %968 = vmatmul.mubr.f32.gmra.mxu1 %v852_v30 }
  0x38   :  { %958 = vmatprep.mubr.f32.mxu0 %v839_v31  ;;  %970 = vmatprep.mubr.f32.mxu1 %v855_v32 }
  0x39   :  { %332 = vadd.xlane.f32.xlu1 %v836_v29  ;;  %328 = vadd.xlane.f32.xlu0 %v832_v23  ;;  %v108_v29 = vld [vmem:[#allocation2 + $0x40] sm:$0xff] }
  0x3b   :  { %959 = vmatmul.mubr.f32.gmra.mxu0 %v840_v35  ;;  %971 = vmatmul.mubr.f32.gmra.mxu1 %v856_v36 }
  0x3c   :  { %961 = vmatprep.mubr.f32.mxu0 %v843_v37  ;;  %973 = vmatprep.mubr.f32.mxu1 %v859_v38 }
  0x3d   :  { %336 = vadd.xlane.f32.xlu1 %v840_v35  ;;  %334 = vadd.xlane.f32.xlu0 %v839_v31  ;;  %v103_v35 = vld [vmem:[#allocation2 + $0x18] sm:$0xff] }
  0x3f   :  { %962 = vmatmul.mubr.f32.gmra.mxu0 %v844_v39  ;;  %974 = vmatmul.mubr.f32.gmra.mxu1 %v860_v40 }
  0x41   :  { %340 = vadd.xlane.f32.xlu1 %v844_v39  ;;  %338 = vadd.xlane.f32.xlu0 %v843_v37 }
  0x45   :  { %344 = vadd.xlane.f32.xlu1 %v848_v24  ;;  %342 = vadd.xlane.f32.xlu0 %v847_v22 }
  0x49   :  { %348 = vadd.xlane.f32.xlu1 %v852_v30  ;;  %346 = vadd.xlane.f32.xlu0 %v851_v26  ;;  %v109_v26 = vld [vmem:[#allocation2 + $0x48] sm:$0xff]  ;;  %v100_v30 = vld [vmem:[#allocation2] sm:$0xff] }
  0x4d   :  { %352 = vadd.xlane.f32.xlu1 %v856_v36  ;;  %350 = vadd.xlane.f32.xlu0 %v855_v32  ;;  %v111_v36 = vld [vmem:[#allocation2 + $0x58] sm:$0xff] }
  0x51   :  { %356 = vadd.xlane.f32.xlu1 %v860_v40  ;;  %354 = vadd.xlane.f32.xlu0 %v859_v38 }
  0xbe   :  { %v331_v43 = vpop.xlane.xlu1 %330  ;;  %v327_v44 = vpop.xlane.xlu0 %326 }
  0xbf   :  { %v360_v45 = vadd.f32 %v331_v43, %v312_v41  ;;  %v358_v46 = vadd.f32 %v327_v44, %v310_v42  ;;  %v110_v41 = vld [vmem:[#allocation2 + $0x50] sm:$0xff] }
  0xc0   :  { %v102_v42 = vld [vmem:[#allocation2 + $0x10] sm:$0xff] }
  0xc1   :  { %377 = vst.msk [vmem:[#allocation3 + $0x10] sm:$0xff] %vm43_vm1, %v360_v45  ;;  %375 = vst.msk [vmem:[#allocation3] sm:$0xff] %vm43_vm1, %v358_v46 }
  0xc2   :  { %v333_v49 = vpop.xlane.xlu1 %332  ;;  %v329_v50 = vpop.xlane.xlu0 %328 }
  0xc3   :  { %v361_v51 = vadd.f32 %v333_v49, %v313_v47  ;;  %v359_v52 = vadd.f32 %v329_v50, %v311_v48  ;;  %v105_v47 = vld [vmem:[#allocation2 + $0x28] sm:$0xff] }
  0xc4   :  { %v113_v48 = vld [vmem:[#allocation2 + $0x68] sm:$0xff] }
  0xc5   :  { %378 = vst.msk [vmem:[#allocation3 + $0x18] sm:$0xff] %vm43_vm1, %v361_v51  ;;  %376 = vst.msk [vmem:[#allocation3 + $0x8] sm:$0xff] %vm43_vm1, %v359_v52 }
  0xc6   :  { %v337_v55 = vpop.xlane.xlu1 %336  ;;  %v335_v56 = vpop.xlane.xlu0 %334 }
  0xc7   :  { %v363_v57 = vadd.f32 %v337_v55, %v315_v53  ;;  %v362_v58 = vadd.f32 %v335_v56, %v314_v54  ;;  %v112_v53 = vld [vmem:[#allocation2 + $0x60] sm:$0xff] }
  0xc8   :  { %v104_v54 = vld [vmem:[#allocation2 + $0x20] sm:$0xff] }
  0xc9   :  { %380 = vst.msk [vmem:[#allocation3 + $0x28] sm:$0xff] %vm43_vm1, %v363_v57  ;;  %379 = vst.msk [vmem:[#allocation3 + $0x20] sm:$0xff] %vm43_vm1, %v362_v58 }
  0xca   :  { %v341_v61 = vpop.xlane.xlu1 %340  ;;  %v339_v62 = vpop.xlane.xlu0 %338 }
  0xcb   :  { %v365_v63 = vadd.f32 %v341_v61, %v317_v59  ;;  %v364_v0 = vadd.f32 %v339_v62, %v316_v60  ;;  %v107_v59 = vld [vmem:[#allocation2 + $0x38] sm:$0xff] }
  0xcc   :  { %v115_v60 = vld [vmem:[#allocation2 + $0x78] sm:$0xff] }
  0xcd   :  { %382 = vst.msk [vmem:[#allocation3 + $0x38] sm:$0xff] %vm43_vm1, %v365_v63  ;;  %381 = vst.msk [vmem:[#allocation3 + $0x30] sm:$0xff] %vm43_vm1, %v364_v0 }
  0xce   :  { %v345_v3 = vpop.xlane.xlu1 %344  ;;  %v343_v4 = vpop.xlane.xlu0 %342 }
  0xcf   :  { %v367_v5 = vadd.f32 %v345_v3, %v319_v1  ;;  %v366_v6 = vadd.f32 %v343_v4, %v318_v2  ;;  %v114_v1 = vld [vmem:[#allocation2 + $0x70] sm:$0xff] }
  0xd0   :  { %v106_v2 = vld [vmem:[#allocation2 + $0x30] sm:$0xff] }
  0xd1   :  { %384 = vst.msk [vmem:[#allocation3 + $0x48] sm:$0xff] %vm43_vm1, %v367_v5  ;;  %383 = vst.msk [vmem:[#allocation3 + $0x40] sm:$0xff] %vm43_vm1, %v366_v6 }
  0xd2   :  { %v349_v9 = vpop.xlane.xlu1 %348  ;;  %v347_v10 = vpop.xlane.xlu0 %346 }
  0xd3   :  { %v369_v11 = vadd.f32 %v349_v9, %v321_v7  ;;  %v368_v12 = vadd.f32 %v347_v10, %v320_v8 }
  0xd5   :  { %386 = vst.msk [vmem:[#allocation3 + $0x58] sm:$0xff] %vm43_vm1, %v369_v11  ;;  %385 = vst.msk [vmem:[#allocation3 + $0x50] sm:$0xff] %vm43_vm1, %v368_v12 }
  0xd6   :  { %v353_v15 = vpop.xlane.xlu1 %352  ;;  %v351_v16 = vpop.xlane.xlu0 %350 }
  0xd7   :  { %v371_v17 = vadd.f32 %v353_v15, %v323_v13  ;;  %v370_v18 = vadd.f32 %v351_v16, %v322_v14 }
  0xd9   :  { %388 = vst.msk [vmem:[#allocation3 + $0x68] sm:$0xff] %vm43_vm1, %v371_v17  ;;  %387 = vst.msk [vmem:[#allocation3 + $0x60] sm:$0xff] %vm43_vm1, %v370_v18 }
  0xda   :  { %v357_v21 = vpop.xlane.xlu1 %356  ;;  %v355_v22 = vpop.xlane.xlu0 %354 }
  0xdb   :  { %v373_v23 = vadd.f32 %v357_v21, %v325_v19  ;;  %v372_v24 = vadd.f32 %v355_v22, %v324_v20 }
  0xdd   :  { %390 = vst.msk [vmem:[#allocation3 + $0x78] sm:$0xff] %vm43_vm1, %v373_v23  ;;  %389 = vst.msk [vmem:[#allocation3 + $0x70] sm:$0xff] %vm43_vm1, %v372_v24 }
  0xf3   :  { %v954_v27 = vpop.f32.mrf.mxu0  ;;  %v966_v28 = vpop.f32.mrf.mxu1 }
  0xf4   :  { %v278_v31 = vadd.f32 %v954_v27, %v101_v25  ;;  %v286_v32 = vadd.f32 %v966_v28, %v109_v26 }
  0xf5   :  { %v238_v33 = vpop.f32.mrf.mxu1  ;;  %v198_v34 = vpop.f32.mrf.mxu0 }
  0xf6   :  { %295 = vst.msk [vmem:[#allocation2 + $0x8] sm:$0xff] %vm26_vm0, %v278_v31  ;;  %303 = vst.msk [vmem:[#allocation2 + $0x48] sm:$0xff] %vm26_vm0, %v286_v32  ;;  %v285_v37 = vadd.f32 %v238_v33, %v108_v29  ;;  %v277_v38 = vadd.f32 %v198_v34, %v100_v30 }
  0xf7   :  { %v957_v39 = vpop.f32.mrf.mxu0  ;;  %v969_v40 = vpop.f32.mrf.mxu1 }
  0xf8   :  { %302 = vst.msk [vmem:[#allocation2 + $0x40] sm:$0xff] %vm26_vm0, %v285_v37  ;;  %294 = vst.msk [vmem:[#allocation2] sm:$0xff] %vm26_vm0, %v277_v38  ;;  %v280_v43 = vadd.f32 %v957_v39, %v103_v35  ;;  %v288_v44 = vadd.f32 %v969_v40, %v111_v36 }
  0xf9   :  { %v248_v45 = vpop.f32.mrf.mxu1  ;;  %v208_v46 = vpop.f32.mrf.mxu0 }
  0xfa   :  { %297 = vst.msk [vmem:[#allocation2 + $0x18] sm:$0xff] %vm26_vm0, %v280_v43  ;;  %305 = vst.msk [vmem:[#allocation2 + $0x58] sm:$0xff] %vm26_vm0, %v288_v44  ;;  %v287_v49 = vadd.f32 %v248_v45, %v110_v41  ;;  %v279_v50 = vadd.f32 %v208_v46, %v102_v42 }
  0xfb   :  { %v960_v51 = vpop.f32.mrf.mxu0  ;;  %v972_v52 = vpop.f32.mrf.mxu1 }
  0xfc   :  { %304 = vst.msk [vmem:[#allocation2 + $0x50] sm:$0xff] %vm26_vm0, %v287_v49  ;;  %296 = vst.msk [vmem:[#allocation2 + $0x10] sm:$0xff] %vm26_vm0, %v279_v50  ;;  %v282_v55 = vadd.f32 %v960_v51, %v105_v47  ;;  %v290_v56 = vadd.f32 %v972_v52, %v113_v48 }
  0xfd   :  { %v258_v57 = vpop.f32.mrf.mxu1  ;;  %v218_v58 = vpop.f32.mrf.mxu0 }
  0xfe   :  { %299 = vst.msk [vmem:[#allocation2 + $0x28] sm:$0xff] %vm26_vm0, %v282_v55  ;;  %307 = vst.msk [vmem:[#allocation2 + $0x68] sm:$0xff] %vm26_vm0, %v290_v56  ;;  %v289_v61 = vadd.f32 %v258_v57, %v112_v53  ;;  %v281_v62 = vadd.f32 %v218_v58, %v104_v54 }
  0xff   :  { %v963_v63 = vpop.f32.mrf.mxu0  ;;  %v975_v0 = vpop.f32.mrf.mxu1 }
 0x100   :  { %306 = vst.msk [vmem:[#allocation2 + $0x60] sm:$0xff] %vm26_vm0, %v289_v61  ;;  %298 = vst.msk [vmem:[#allocation2 + $0x20] sm:$0xff] %vm26_vm0, %v281_v62  ;;  %v284_v3 = vadd.f32 %v963_v63, %v107_v59  ;;  %v292_v4 = vadd.f32 %v975_v0, %v115_v60 }
 0x101   :  { %v268_v5 = vpop.f32.mrf.mxu1  ;;  %v228_v6 = vpop.f32.mrf.mxu0 }
 0x102   :  { %301 = vst.msk [vmem:[#allocation2 + $0x38] sm:$0xff] %vm26_vm0, %v284_v3  ;;  %309 = vst.msk [vmem:[#allocation2 + $0x78] sm:$0xff] %vm26_vm0, %v292_v4  ;;  %v291_v7 = vadd.f32 %v268_v5, %v114_v1  ;;  %v283_v8 = vadd.f32 %v228_v6, %v106_v2 }
 0x104   :  { %308 = vst.msk [vmem:[#allocation2 + $0x70] sm:$0xff] %vm26_vm0, %v291_v7  ;;  %300 = vst.msk [vmem:[#allocation2 + $0x30] sm:$0xff] %vm26_vm0, %v283_v8 }
 0x105 PF:  { %v395_v9 = vld [vmem:[#allocation3 + $0x8] sm:$0xff]  ;;  %v394_v10 = vld [vmem:[#allocation3] sm:$0xff]  ;;  %v1085_v12 = vmov 0   ;;  %v396_v15 = vld [vmem:[#allocation3 + $0x10] sm:$0xff] }
 0x106   :  { %1051 = vset.pattern.permute.xlu1 %v1085_v12  ;;  %1050 = vset.pattern.permute.xlu0 %v1085_v12  ;;  %1052 = vrcp.f32 %v395_v9  ;;  %v573_v16 = vld [vmem:[%s1391_s4 + $0x18] sm:$0xff]  ;;  %v572_v17 = vld [vmem:[%s1391_s4 + $0x10] sm:$0xff]  ;;  %v571_v18 = vld [vmem:[%s1391_s4 + $0x8] sm:$0xff] }
 0x107   :  { %1054 = vrcp.f32 %v394_v10  ;;  %976 = vmatprep.subr.mxu0 %v573_v16  ;;  %1040 = vmatprep.subr.mxu1 %v573_v16  ;;  %v397_v20 = vld [vmem:[#allocation3 + $0x18] sm:$0xff]  ;;  %v570_v21 = vld [vmem:[%s1391_s4] sm:$0xff]  ;;  %v399_v29 = vld [vmem:[#allocation3 + $0x28] sm:$0xff] }
 0x108   :  { %v403_v11 = vld [vmem:[#allocation3 + $0x48] sm:$0xff]  ;;  %v402_v13 = vld [vmem:[#allocation3 + $0x40] sm:$0xff]  ;;  %977 = vmatpush3.msra.mxu0 %v573_v16  ;;  %1044 = vmatpush3.msra.mxu1 %v573_v16  ;;  %v400_v33 = vld [vmem:[#allocation3 + $0x30] sm:$0xff] }
 0x109   :  { %1056 = vrcp.f32 %v403_v11  ;;  %v404_v14 = vld [vmem:[#allocation3 + $0x50] sm:$0xff]  ;;  %v405_v19 = vld [vmem:[#allocation3 + $0x58] sm:$0xff]  ;;  %978 = vmatprep.subr.mxu0 %v572_v17  ;;  %1041 = vmatprep.subr.mxu1 %v572_v17  ;;  %v398_v23 = vld [vmem:[#allocation3 + $0x20] sm:$0xff] }
 0x10a   :  { %1058 = vrcp.f32 %v402_v13  ;;  %979 = vmatpush3.msra.mxu0 %v572_v17  ;;  %1045 = vmatpush3.msra.mxu1 %v572_v17  ;;  %v406_v22 = vld [vmem:[#allocation3 + $0x60] sm:$0xff]  ;;  %v407_v27 = vld [vmem:[#allocation3 + $0x68] sm:$0xff]  ;;  %v401_v37 = vld [vmem:[#allocation3 + $0x38] sm:$0xff] }
 0x10b   :  { %1060 = vrcp.f32 %v404_v14  ;;  %980 = vmatprep.subr.mxu0 %v571_v18  ;;  %1042 = vmatprep.subr.mxu1 %v571_v18  ;;  %v408_v31 = vld [vmem:[#allocation3 + $0x70] sm:$0xff]  ;;  %v409_v35 = vld [vmem:[#allocation3 + $0x78] sm:$0xff]  ;;  %v427_v46 = vld [vmem:[#allocation2 + $0x8] sm:$0xff] }
 0x10c   :  { %1062 = vrcp.f32 %v396_v15  ;;  %981 = vmatpush3.msra.mxu0 %v571_v18  ;;  %1046 = vmatpush3.msra.mxu1 %v571_v18  ;;  %v443_v47 = vld [vmem:[%s1390_s3 + $0x8] sm:$0xff]  ;;  %v426_v48 = vld [vmem:[#allocation2] sm:$0xff]  ;;  %v436_v62 = vld [vmem:[#allocation2 + $0x50] sm:$0xff] }
 0x10d   :  { %1064 = vrcp.f32 %v405_v19  ;;  %982 = vmatprep.subr.mxu0 %v570_v21  ;;  %1043 = vmatprep.subr.mxu1 %v570_v21  ;;  %v442_v49 = vld [vmem:[%s1390_s3] sm:$0xff]  ;;  %v459_v50 = vadd.f32 %v443_v47, %v427_v46  ;;  %v435_v52 = vld [vmem:[#allocation2 + $0x48] sm:$0xff]  ;;  %v452_v63 = vld [vmem:[%s1390_s3 + $0x50] sm:$0xff] }
 0x10e   :  { %1066 = vrcp.f32 %v397_v20  ;;  %983 = vmatpush3.msra.mxu0 %v570_v21  ;;  %1047 = vmatpush3.msra.mxu1 %v570_v21  ;;  %v458_v51 = vadd.f32 %v442_v49, %v426_v48  ;;  %v451_v53 = vld [vmem:[%s1390_s3 + $0x48] sm:$0xff]  ;;  %v434_v54 = vld [vmem:[#allocation2 + $0x40] sm:$0xff]  ;;  %v428_v0 = vld [vmem:[#allocation2 + $0x10] sm:$0xff]  ;;  %v468_v5 = vadd.f32 %v452_v63, %v436_v62 }
 0x10f   :  { %1068 = vrcp.f32 %v406_v22  ;;  %v450_v55 = vld [vmem:[%s1390_s3 + $0x40] sm:$0xff]  ;;  %v467_v59 = vadd.f32 %v451_v53, %v435_v52  ;;  %v444_v1 = vld [vmem:[%s1390_s3 + $0x10] sm:$0xff]  ;;  %v437_v8 = vld [vmem:[#allocation2 + $0x58] sm:$0xff] }
 0x110   :  { %1070 = vrcp.f32 %v398_v23  ;;  %v466_v61 = vadd.f32 %v450_v55, %v434_v54  ;;  %v460_v7 = vadd.f32 %v444_v1, %v428_v0  ;;  %v453_v9 = vld [vmem:[%s1390_s3 + $0x58] sm:$0xff]  ;;  %v438_v18 = vld [vmem:[#allocation2 + $0x60] sm:$0xff] }
 0x111   :  { %1072 = vrcp.f32 %v407_v27  ;;  %v429_v10 = vld [vmem:[#allocation2 + $0x18] sm:$0xff]  ;;  %v469_v15 = vadd.f32 %v453_v9, %v437_v8  ;;  %v454_v19 = vld [vmem:[%s1390_s3 + $0x60] sm:$0xff] }
 0x112   :  { %1074 = vrcp.f32 %v399_v29  ;;  %v445_v11 = vld [vmem:[%s1390_s3 + $0x18] sm:$0xff]  ;;  %v430_v20 = vld [vmem:[#allocation2 + $0x20] sm:$0xff]  ;;  %v455_v29 = vld [vmem:[%s1390_s3 + $0x68] sm:$0xff] }
 0x113   :  { %v1053_v24 = vpop.eup %1052  ;;  %1076 = vrcp.f32 %v408_v31  ;;  %v461_v17 = vadd.f32 %v445_v11, %v429_v10  ;;  %v446_v21 = vld [vmem:[%s1390_s3 + $0x20] sm:$0xff]  ;;  %v447_v31 = vld [vmem:[%s1390_s3 + $0x28] sm:$0xff]  ;;  %v441_v48 = vld [vmem:[#allocation2 + $0x78] sm:$0xff] }
 0x114   :  { %v1055_v25 = vpop.eup %1054  ;;  %481 = vperm.xlu1 %1051, %v1053_v24   ;;  %1078 = vrcp.f32 %v400_v33  ;;  %v462_v27 = vadd.f32 %v446_v21, %v430_v20  ;;  %v457_v49 = vld [vmem:[%s1390_s3 + $0x78] sm:$0xff]  ;;  %v812_v62 = vld [vmem:[%s1392_s5] ss:$0 sm:$0xff] }
 0x115   :  { %476 = vperm.xlu0 %1050, %v1055_v25   ;;  %1080 = vrcp.f32 %v409_v35  ;;  %v470_v25 = vadd.f32 %v454_v19, %v438_v18  ;;  %v473_v55 = vadd.f32 %v457_v49, %v441_v48 }
 0x116   :  { %v1057_v26 = vpop.eup %1056  ;;  %1082 = vrcp.f32 %v401_v37 }
 0x117   :  { %v1059_v28 = vpop.eup %1058 }
 0x118   :  { %521 = vperm.xlu1 %1051, %v1057_v26   ;;  %v1061_v30 = vpop.eup %1060 }
 0x119   :  { %516 = vperm.xlu0 %1050, %v1059_v28   ;;  %v1063_v32 = vpop.eup %1062  ;;  %v439_v28 = vld [vmem:[#allocation2 + $0x68] sm:$0xff] }
 0x11a   :  { %v1065_v34 = vpop.eup %1064  ;;  %v471_v35 = vadd.f32 %v455_v29, %v439_v28 }
 0x11b   :  { %v1067_v36 = vpop.eup %1066 }
 0x11c   :  { %526 = vperm.xlu1 %1051, %v1061_v30   ;;  %v1069_v38 = vpop.eup %1068  ;;  %v431_v30 = vld [vmem:[#allocation2 + $0x28] sm:$0xff] }
 0x11d   :  { %486 = vperm.xlu0 %1050, %v1063_v32   ;;  %v1071_v39 = vpop.eup %1070  ;;  %v463_v37 = vadd.f32 %v447_v31, %v431_v30 }
 0x11e   :  { %v1073_v40 = vpop.eup %1072 }
 0x11f   :  { %v1075_v41 = vpop.eup %1074 }
 0x120   :  { %531 = vperm.xlu1 %1051, %v1065_v34   ;;  %v1077_v42 = vpop.eup %1076 }
 0x121   :  { %491 = vperm.xlu0 %1050, %v1067_v36   ;;  %v1079_v43 = vpop.eup %1078 }
 0x122   :  { %v1081_v44 = vpop.eup %1080 }
 0x123   :  { %v1083_v45 = vpop.eup %1082 }
 0x124   :  { %536 = vperm.xlu1 %1051, %v1069_v38   ;;  %v440_v38 = vld [vmem:[#allocation2 + $0x70] sm:$0xff] }
 0x125   :  { %496 = vperm.xlu0 %1050, %v1071_v39   ;;  %v456_v39 = vld [vmem:[%s1390_s3 + $0x70] sm:$0xff] }
 0x128   :  { %541 = vperm.xlu1 %1051, %v1073_v40   ;;  %v432_v40 = vld [vmem:[#allocation2 + $0x30] sm:$0xff] }
 0x129   :  { %501 = vperm.xlu0 %1050, %v1075_v41   ;;  %v448_v41 = vld [vmem:[%s1390_s3 + $0x30] sm:$0xff] }
 0x12a   :  { %v464_v47 = vadd.f32 %v448_v41, %v432_v40 }
 0x12c   :  { %546 = vperm.xlu1 %1051, %v1077_v42  }
 0x12d   :  { %506 = vperm.xlu0 %1050, %v1079_v43  }
 0x130   :  { %551 = vperm.xlu1 %1051, %v1081_v44  }
 0x131   :  { %511 = vperm.xlu0 %1050, %v1083_v45   ;;  %v472_v45 = vadd.f32 %v456_v39, %v440_v38 }
 0x18f   :  { %v482_v56 = vpop.permute.xlu1 %481 }
 0x190   :  { %v555_v57 = vmul.f32 %v482_v56, %v459_v50  ;;  %v477_v58 = vpop.permute.xlu0 %476  ;;  %v433_v50 = vld [vmem:[#allocation2 + $0x38] sm:$0xff] }
 0x191   :  { %v554_v60 = vmul.f32 %v477_v58, %v458_v51  ;;  %v449_v51 = vld [vmem:[%s1390_s3 + $0x38] sm:$0xff] }
 0x193   :  { %984 = vmatprep.mubr.msk.f32.mxu0 %vm26_vm0, %v554_v60  ;;  %v522_v2 = vpop.permute.xlu1 %521 }
 0x194   :  { %v563_v3 = vmul.f32 %v522_v2, %v467_v59  ;;  %985 = vmatmul.mubr.msk.f32.vlgmr.msra.gmra.mxu0 %vm26_vm0, %v555_v57  ;;  %v517_v4 = vpop.permute.xlu0 %516  ;;  %v465_v57 = vadd.f32 %v449_v51, %v433_v50 }
 0x195   :  { %v562_v6 = vmul.f32 %v517_v4, %v466_v61 }
 0x197   :  { %996 = vmatprep.mubr.msk.f32.mxu1 %vm26_vm0, %v562_v6  ;;  %v527_v12 = vpop.permute.xlu1 %526 }
 0x198   :  { %v564_v13 = vmul.f32 %v527_v12, %v468_v5  ;;  %997 = vmatmul.mubr.msk.f32.vlgmr.msra.gmra.mxu1 %vm26_vm0, %v563_v3  ;;  %v487_v14 = vpop.permute.xlu0 %486 }
 0x199   :  { %v556_v16 = vmul.f32 %v487_v14, %v460_v7 }
 0x19a   :  { %999 = vmatprep.mubr.msk.f32.mxu1 %vm26_vm0, %v564_v13 }
 0x19b   :  { %987 = vmatprep.mubr.msk.f32.mxu0 %vm26_vm0, %v556_v16  ;;  %v532_v22 = vpop.permute.xlu1 %531 }
 0x19c   :  { %v565_v23 = vmul.f32 %v532_v22, %v469_v15  ;;  %v492_v24 = vpop.permute.xlu0 %491 }
 0x19d   :  { %v557_v26 = vmul.f32 %v492_v24, %v461_v17 }
 0x19e   :  { %1000 = vmatmul.mubr.msk.f32.gmra.mxu1 %vm26_vm0, %v565_v23 }
 0x19f   :  { %988 = vmatmul.mubr.msk.f32.gmra.mxu0 %vm26_vm0, %v557_v26  ;;  %v537_v32 = vpop.permute.xlu1 %536 }
 0x1a0   :  { %v566_v33 = vmul.f32 %v537_v32, %v470_v25  ;;  %v497_v34 = vpop.permute.xlu0 %496 }
 0x1a1   :  { %v558_v36 = vmul.f32 %v497_v34, %v462_v27 }
 0x1a2   :  { %1002 = vmatprep.mubr.msk.f32.mxu1 %vm26_vm0, %v566_v33 }
 0x1a3   :  { %990 = vmatprep.mubr.msk.f32.mxu0 %vm26_vm0, %v558_v36  ;;  %v542_v42 = vpop.permute.xlu1 %541 }
 0x1a4   :  { %v567_v43 = vmul.f32 %v542_v42, %v471_v35  ;;  %v502_v44 = vpop.permute.xlu0 %501 }
 0x1a5   :  { %v559_v46 = vmul.f32 %v502_v44, %v463_v37 }
 0x1a6   :  { %1003 = vmatmul.mubr.msk.f32.gmra.mxu1 %vm26_vm0, %v567_v43 }
 0x1a7   :  { %991 = vmatmul.mubr.msk.f32.gmra.mxu0 %vm26_vm0, %v559_v46  ;;  %v547_v52 = vpop.permute.xlu1 %546 }
 0x1a8   :  { %v568_v53 = vmul.f32 %v547_v52, %v472_v45  ;;  %v507_v54 = vpop.permute.xlu0 %506 }
 0x1a9   :  { %v560_v56 = vmul.f32 %v507_v54, %v464_v47 }
 0x1aa   :  { %1005 = vmatprep.mubr.msk.f32.mxu1 %vm26_vm0, %v568_v53 }
 0x1ab   :  { %993 = vmatprep.mubr.msk.f32.mxu0 %vm26_vm0, %v560_v56  ;;  %v552_v58 = vpop.permute.xlu1 %551 }
 0x1ac   :  { %v569_v59 = vmul.f32 %v552_v58, %v473_v55  ;;  %v512_v60 = vpop.permute.xlu0 %511 }
 0x1ad   :  { %v561_v61 = vmul.f32 %v512_v60, %v465_v57 }
 0x1ae   :  { %1006 = vmatmul.mubr.msk.f32.gmra.mxu1 %vm26_vm0, %v569_v59 }
 0x1af   :  { %994 = vmatmul.mubr.msk.f32.gmra.mxu0 %vm26_vm0, %v561_v61 }
 0x254   :  { %v986_v63 = vpop.f32.mrf.mxu0 }
 0x255   :  { %v702_v0 = vadd.f32 %v986_v63, %v812_v62 }
 0x256   :  { %v696_v1 = vpop.f32.mrf.mxu0 }
 0x257   :  { %v776_v2 = vmax.f32 %v702_v0, 0.0  ;;  %v697_v3 = vadd.f32 %v812_v62, %v696_v1 }
 0x258   :  { %v998_v4 = vpop.f32.mrf.mxu1 }
 0x259   :  { %792 = vst [vmem:[%s1393_s6 + $0x8] sm:$0xff] %v776_v2  ;;  %v775_v5 = vmax.f32 %v697_v3, 0.0  ;;  %v742_v6 = vadd.f32 %v998_v4, %v812_v62 }
 0x25a   :  { %v736_v7 = vpop.f32.mrf.mxu1 }
 0x25b   :  { %791 = vst [vmem:[%s1393_s6] sm:$0xff] %v775_v5  ;;  %v784_v8 = vmax.f32 %v742_v6, 0.0  ;;  %v737_v9 = vadd.f32 %v812_v62, %v736_v7 }
 0x25d   :  { %800 = vst [vmem:[%s1393_s6 + $0x48] sm:$0xff] %v784_v8  ;;  %v783_v10 = vmax.f32 %v737_v9, 0.0 }
 0x25e   :  { %v1001_v11 = vpop.f32.mrf.mxu1 }
 0x25f   :  { %799 = vst [vmem:[%s1393_s6 + $0x40] sm:$0xff] %v783_v10  ;;  %v989_v12 = vpop.f32.mrf.mxu0  ;;  %v752_v13 = vadd.f32 %v1001_v11, %v812_v62 }
 0x260   :  { %v712_v14 = vadd.f32 %v989_v12, %v812_v62  ;;  %v746_v15 = vpop.f32.mrf.mxu1 }
 0x261   :  { %v786_v16 = vmax.f32 %v752_v13, 0.0  ;;  %v706_v17 = vpop.f32.mrf.mxu0  ;;  %v747_v18 = vadd.f32 %v812_v62, %v746_v15 }
 0x262   :  { %v778_v19 = vmax.f32 %v712_v14, 0.0  ;;  %v707_v20 = vadd.f32 %v812_v62, %v706_v17 }
 0x263   :  { %802 = vst [vmem:[%s1393_s6 + $0x58] sm:$0xff] %v786_v16  ;;  %v785_v21 = vmax.f32 %v747_v18, 0.0 }
 0x264   :  { %794 = vst [vmem:[%s1393_s6 + $0x18] sm:$0xff] %v778_v19  ;;  %v777_v22 = vmax.f32 %v707_v20, 0.0 }
 0x265   :  { %801 = vst [vmem:[%s1393_s6 + $0x50] sm:$0xff] %v785_v21 }
 0x266   :  { %793 = vst [vmem:[%s1393_s6 + $0x10] sm:$0xff] %v777_v22  ;;  %v1004_v23 = vpop.f32.mrf.mxu1 }
 0x267   :  { %v992_v24 = vpop.f32.mrf.mxu0  ;;  %v762_v25 = vadd.f32 %v1004_v23, %v812_v62 }
 0x268   :  { %v722_v26 = vadd.f32 %v992_v24, %v812_v62  ;;  %v756_v27 = vpop.f32.mrf.mxu1 }
 0x269   :  { %v788_v28 = vmax.f32 %v762_v25, 0.0  ;;  %v716_v29 = vpop.f32.mrf.mxu0  ;;  %v757_v30 = vadd.f32 %v812_v62, %v756_v27 }
 0x26a   :  { %v780_v31 = vmax.f32 %v722_v26, 0.0  ;;  %v717_v32 = vadd.f32 %v812_v62, %v716_v29 }
 0x26b   :  { %804 = vst [vmem:[%s1393_s6 + $0x68] sm:$0xff] %v788_v28  ;;  %v787_v33 = vmax.f32 %v757_v30, 0.0 }
 0x26c   :  { %796 = vst [vmem:[%s1393_s6 + $0x28] sm:$0xff] %v780_v31  ;;  %v779_v34 = vmax.f32 %v717_v32, 0.0 }
 0x26d   :  { %803 = vst [vmem:[%s1393_s6 + $0x60] sm:$0xff] %v787_v33 }
 0x26e   :  { %795 = vst [vmem:[%s1393_s6 + $0x20] sm:$0xff] %v779_v34  ;;  %v1007_v35 = vpop.f32.mrf.mxu1 }
 0x26f   :  { %v995_v36 = vpop.f32.mrf.mxu0  ;;  %v772_v37 = vadd.f32 %v1007_v35, %v812_v62 }
 0x270   :  { %v732_v38 = vadd.f32 %v995_v36, %v812_v62  ;;  %v766_v39 = vpop.f32.mrf.mxu1 }
 0x271   :  { %v790_v40 = vmax.f32 %v772_v37, 0.0  ;;  %v726_v41 = vpop.f32.mrf.mxu0  ;;  %v767_v42 = vadd.f32 %v812_v62, %v766_v39 }
 0x272   :  { %v782_v43 = vmax.f32 %v732_v38, 0.0  ;;  %v727_v44 = vadd.f32 %v812_v62, %v726_v41 }
 0x273   :  { %806 = vst [vmem:[%s1393_s6 + $0x78] sm:$0xff] %v790_v40  ;;  %v789_v45 = vmax.f32 %v767_v42, 0.0 }
 0x274   :  { %798 = vst [vmem:[%s1393_s6 + $0x38] sm:$0xff] %v782_v43  ;;  %v781_v46 = vmax.f32 %v727_v44, 0.0 }
 0x275   :  { %805 = vst [vmem:[%s1393_s6 + $0x70] sm:$0xff] %v789_v45 }
 0x276   :  { %797 = vst [vmem:[%s1393_s6 + $0x30] sm:$0xff] %v781_v46 }

</bundles_post_ra>
